<compile_context>
chip_gen: v6e
topology: v6e:2x2x1
jax: 0.10.0
libtpu: 0.0.40
codegen_flags: <defaults>
</compile_context>

<pallas_src>
import jax
import jax.numpy as jnp
from jax.experimental import pallas as pl
from jax.experimental.pallas import tpu as pltpu


# ----------------------------------------------------------------------------
# Kernel
# ----------------------------------------------------------------------------

def _dot_scaled(a_f32, w_ref, col_scale):
    """a_f32 @ dequant(w) with per-output-column scale `col_scale`.

    int8 weights: dynamic symmetric per-row activation quantization, native
    int8 x int8 MXU dot with int32 accumulation, then dequantize.
    bf16 weights: plain bf16 x bf16 MXU dot with f32 accumulation.
    """
    w = w_ref[...]
    if w.dtype == jnp.int8:
        amax = jnp.max(jnp.abs(a_f32), axis=-1, keepdims=True)      # (B, 1)
        row_scale = jnp.maximum(amax, 1e-12) * (1.0 / 127.0)
        a_q = jnp.clip(jnp.round(a_f32 / row_scale),
                       -127.0, 127.0).astype(jnp.int8)
        acc = jnp.dot(a_q, w, preferred_element_type=jnp.int32)
        return acc.astype(jnp.float32) * (row_scale * col_scale)
    acc = jnp.dot(a_f32.astype(jnp.bfloat16), w,
                  preferred_element_type=jnp.float32)
    return acc * col_scale


def _landmark_kernel(x_ref, w1_ref, sb1_ref, alpha_ref, w2_ref, sb2_ref, o_ref):
    s1, b1 = sb1_ref[0:1, :], sb1_ref[1:2, :]      # (1, 256) each, f32
    s2, b2 = sb2_ref[0:1, :], sb2_ref[1:2, :]      # (1, 136) each, f32

    # fc1 (+ BatchNorm folded into w1/b1); input cast happens in-kernel.
    h = _dot_scaled(x_ref[...], w1_ref, s1) + b1
    # PReLU (single learned parameter, scalar in SMEM)
    alpha = alpha_ref[0, 0]
    h = jnp.where(h >= 0.0, h, alpha * h)
    # fc2 at its native 136-wide output (no lane padding)
    out = _dot_scaled(h, w2_ref, s2) + b2
    o_ref[...] = out.astype(o_ref.dtype)


def face_landmark_net(x, prepared):
    """Fused forward pass. x: (B, in_features) f32. Returns (B, num_points*2) f32."""
    B, F = x.shape
    H = prepared["w1"].shape[1]
    P = prepared["w2"].shape[1]

    full = lambda shape: pl.BlockSpec(shape, lambda i: (0,) * len(shape))

    wb = prepared["w1"].dtype.itemsize
    bytes_accessed = (B * F * 4 + F * H * wb + H * P * wb
                      + 2 * H * 4 + 2 * P * 4 + 4 + B * P * 4)
    cost = pl.CostEstimate(flops=2 * B * F * H + 2 * B * H * P,
                           transcendentals=0,
                           bytes_accessed=bytes_accessed)

    return pl.pallas_call(
        _landmark_kernel,
        out_shape=jax.ShapeDtypeStruct((B, P), jnp.float32),
        grid=(1,),
        in_specs=[
            full((B, F)),      # x (f32) -- cast/quant happens in-kernel
            full((F, H)),      # w1 (int8 or bf16), BN folded
            full((2, H)),      # [s1 ; b1] f32
            pl.BlockSpec(memory_space=pltpu.MemorySpace.SMEM),   # alpha (1,1) f32
            full((H, P)),      # w2 (int8 or bf16)
            full((2, P)),      # [s2 ; b2] f32
        ],
        out_specs=full((B, P)),
        compiler_params=pltpu.CompilerParams(
            dimension_semantics=("arbitrary",)),
        cost_estimate=cost,
    )(x, prepared["w1"], prepared["sb1"], prepared["alpha"],
      prepared["w2"], prepared["sb2"])


# ----------------------------------------------------------------------------
# Parameter construction / preparation
# ----------------------------------------------------------------------------

def _supports_int8_mxu():
    """int8 weights only where the MXU int path is known-native (v5/v6).
    v7x has an fp8 (not int) MXU; older generations are not targeted."""
    try:
        kind = jax.devices()[0].device_kind.lower()
    except Exception:
        return False
    return ("v5" in kind) or ("v6" in kind)


def _quantize_per_output_channel(w):
    """Symmetric int8 quantization with one scale per output column."""
    amax = jnp.max(jnp.abs(w), axis=0, keepdims=True)            # (1, N)
    scale = jnp.where(amax > 0.0, amax / 127.0, 1.0)
    w_q = jnp.clip(jnp.round(w / scale), -127.0, 127.0).astype(jnp.int8)
    return w_q, scale.astype(jnp.float32)


def init_raw_params(key, in_features=512, hidden=256, num_points=68):
    """Deterministic synthetic parameters matching the nn.Module layout."""
    P = num_points * 2
    k = jax.random.split(key, 8)
    # Linear weights stored as (in, out) = W.T relative to PyTorch's (out, in)
    w1 = jax.random.normal(k[0], (in_features, hidden), jnp.float32) * (
        1.0 / jnp.sqrt(in_features))
    b1 = jax.random.normal(k[1], (1, hidden), jnp.float32) * 0.01
    w2 = jax.random.normal(k[2], (hidden, P), jnp.float32) * (
        1.0 / jnp.sqrt(hidden))
    b2 = jax.random.normal(k[3], (1, P), jnp.float32) * 0.01
    # BatchNorm1d(hidden): gamma, beta, running_mean, running_var (eval mode)
    gamma = 1.0 + 0.1 * jax.random.normal(k[4], (1, hidden), jnp.float32)
    beta = 0.1 * jax.random.normal(k[5], (1, hidden), jnp.float32)
    running_mean = 0.1 * jax.random.normal(k[6], (1, hidden), jnp.float32)
    running_var = jnp.abs(
        1.0 + 0.1 * jax.random.normal(k[7], (1, hidden), jnp.float32))
    # PReLU default init = 0.25, single parameter
    alpha = jnp.full((1, 1), 0.25, jnp.float32)
    return dict(w1=w1, b1=b1, w2=w2, b2=b2, gamma=gamma, beta=beta,
                running_mean=running_mean, running_var=running_var,
                alpha=alpha, eps=1e-5)


def prepare_params(raw, quantize_int8):
    """Fold BN into fc1, then quantize weights (int8 per-channel) or cast bf16."""
    bn_scale = raw["gamma"] / jnp.sqrt(raw["running_var"] + raw["eps"])  # (1, H)
    bn_shift = raw["beta"] - raw["running_mean"] * bn_scale
    w1_f = raw["w1"] * bn_scale                 # scale per output column
    b1_f = raw["b1"] * bn_scale + bn_shift
    w2_f, b2_f = raw["w2"], raw["b2"]

    if quantize_int8:
        w1_q, s1 = _quantize_per_output_channel(w1_f)
        w2_q, s2 = _quantize_per_output_channel(w2_f)
    else:
        w1_q = w1_f.astype(jnp.bfloat16)
        s1 = jnp.ones((1, w1_f.shape[1]), jnp.float32)
        w2_q = w2_f.astype(jnp.bfloat16)
        s2 = jnp.ones((1, w2_f.shape[1]), jnp.float32)

    sb1 = jnp.concatenate([s1, b1_f], axis=0).astype(jnp.float32)   # (2, 256)
    sb2 = jnp.concatenate([s2, b2_f], axis=0).astype(jnp.float32)   # (2, 136)

    return dict(w1=w1_q, w2=w2_q, sb1=sb1, sb2=sb2,
                alpha=raw["alpha"].astype(jnp.float32))


# ----------------------------------------------------------------------------
# References
# ----------------------------------------------------------------------------

def _reference_module(x, raw):
    """Pure-JAX f32 reference of the original (unfused) module semantics."""
    h = x @ raw["w1"] + raw["b1"]
    h = (h - raw["running_mean"]) / jnp.sqrt(raw["running_var"] + raw["eps"])
    h = h * raw["gamma"] + raw["beta"]
    h = jnp.where(h >= 0.0, h, raw["alpha"][0, 0] * h)
    return h @ raw["w2"] + raw["b2"]


def _ref_dot_scaled(a, w_q, col_scale):
    if w_q.dtype == jnp.int8:
        amax = jnp.max(jnp.abs(a), axis=-1, keepdims=True)
        rs = jnp.maximum(amax, 1e-12) / 127.0
        a_q = jnp.clip(jnp.round(a / rs), -127.0, 127.0)
        return (a_q @ w_q.astype(jnp.float32)) * (rs * col_scale)
    ab = a.astype(jnp.bfloat16).astype(jnp.float32)
    return (ab @ w_q.astype(jnp.float32)) * col_scale


def _reference_fused(x, prepared):
    """Pure-JAX reference mirroring the kernel's (de)quantized arithmetic."""
    s1, b1 = prepared["sb1"][0:1, :], prepared["sb1"][1:2, :]
    s2, b2 = prepared["sb2"][0:1, :], prepared["sb2"][1:2, :]
    alpha = prepared["alpha"][0, 0]
    h = _ref_dot_scaled(x, prepared["w1"], s1) + b1
    h = jnp.where(h >= 0.0, h, alpha * h)
    return _ref_dot_scaled(h, prepared["w2"], s2) + b2


# ----------------------------------------------------------------------------
# Main
# ----------------------------------------------------------------------------

if __name__ == "__main__":
    key = jax.random.PRNGKey(0)
    kx, kp = jax.random.split(key)

    B, IN_FEATURES, NUM_POINTS = 8, 512, 68
    x = jax.random.normal(kx, (B, IN_FEATURES), jnp.float32)

    raw = init_raw_params(kp, in_features=IN_FEATURES, hidden=256,
                          num_points=NUM_POINTS)

    use_int8 = _supports_int8_mxu()
    prepared = prepare_params(raw, quantize_int8=use_int8)
    try:
        out = jax.block_until_ready(face_landmark_net(x, prepared))
    except Exception:
        if not use_int8:
            raise
        # Capability fallback: if the int8 MXU path does not lower on this
        # chip, rerun the same fused kernel with bf16 weights.
        prepared = prepare_params(raw, quantize_int8=False)
        out = jax.block_until_ready(face_landmark_net(x, prepared))

    assert out.shape == (B, NUM_POINTS * 2), out.shape

    # Tight check against a reference that mirrors the kernel's quantized /
    # bf16 arithmetic exactly (tolerance covers matmul-precision + one
    # requant-rounding-step disagreements).
    ref_fused = _reference_fused(x, prepared)
    err_fused = float(jnp.max(jnp.abs(out - ref_fused)))
    assert jnp.allclose(out, ref_fused, atol=2e-2, rtol=2e-2), (
        "mismatch vs arithmetic-matched reference, max abs err = %g" % err_fused)

    # Loose check against the original full-f32 module semantics (difference
    # is int8/bf16 weight quantization + activation rounding only).
    ref_mod = _reference_module(x, raw)
    err_mod = float(jnp.max(jnp.abs(out - ref_mod)))
    assert jnp.allclose(out, ref_mod, atol=1.5e-1), (
        "mismatch vs f32 module reference, max abs err = %g" % err_mod)

    print("KERNEL_OK")
</pallas_src>

<mosaic_0001>
module attributes {stable_mosaic.version = 11 : i64} {
  func.func @_landmark_kernel(%arg0: i32, %arg1: memref<8x512xf32, #tpu.memory_space<vmem>>, %arg2: memref<512x256xbf16, #tpu.memory_space<vmem>>, %arg3: memref<2x256xf32, #tpu.memory_space<vmem>>, %arg4: memref<1x1xf32, #tpu.memory_space<smem>>, %arg5: memref<256x136xbf16, #tpu.memory_space<vmem>>, %arg6: memref<2x136xf32, #tpu.memory_space<vmem>>, %arg7: memref<8x136xf32, #tpu.memory_space<vmem>>) attributes {dimension_semantics = [#tpu.dimension_semantics<arbitrary>], iteration_bounds = array<i64: 1>, scalar_prefetch = 0 : i64, scratch_operands = 0 : i64, tpu.core_type = #tpu.core_type<tc>, window_params = [{pipeline_mode = #tpu.pipeline_mode<synchronous>, transform_indices = @transform_0, window_bounds = array<i64: 8, 512>}, {pipeline_mode = #tpu.pipeline_mode<synchronous>, transform_indices = @transform_1, window_bounds = array<i64: 512, 256>}, {pipeline_mode = #tpu.pipeline_mode<synchronous>, transform_indices = @transform_2, window_bounds = array<i64: 2, 256>}, {transform_indices = @transform_3, window_bounds = array<i64: 1, 1>}, {pipeline_mode = #tpu.pipeline_mode<synchronous>, transform_indices = @transform_4, window_bounds = array<i64: 256, 136>}, {pipeline_mode = #tpu.pipeline_mode<synchronous>, transform_indices = @transform_5, window_bounds = array<i64: 2, 136>}, {pipeline_mode = #tpu.pipeline_mode<synchronous>, transform_indices = @transform_6, window_bounds = array<i64: 8, 136>}]} {
    %c0 = arith.constant 0 : index
    %c0_0 = arith.constant 0 : index
    %0 = vector.load %arg3[%c0, %c0_0] : memref<2x256xf32, #tpu.memory_space<vmem>>, vector<1x256xf32>
    %c1 = arith.constant 1 : index
    %c0_1 = arith.constant 0 : index
    %1 = vector.load %arg3[%c1, %c0_1] : memref<2x256xf32, #tpu.memory_space<vmem>>, vector<1x256xf32>
    %c0_2 = arith.constant 0 : index
    %c0_3 = arith.constant 0 : index
    %2 = vector.load %arg6[%c0_2, %c0_3] : memref<2x136xf32, #tpu.memory_space<vmem>>, vector<1x136xf32>
    %c1_4 = arith.constant 1 : index
    %c0_5 = arith.constant 0 : index
    %3 = vector.load %arg6[%c1_4, %c0_5] : memref<2x136xf32, #tpu.memory_space<vmem>>, vector<1x136xf32>
    %c0_6 = arith.constant 0 : index
    %c0_7 = arith.constant 0 : index
    %4 = vector.load %arg1[%c0_6, %c0_7] : memref<8x512xf32, #tpu.memory_space<vmem>>, vector<8x512xf32>
    %c0_8 = arith.constant 0 : index
    %c0_9 = arith.constant 0 : index
    %5 = vector.load %arg2[%c0_8, %c0_9] : memref<512x256xbf16, #tpu.memory_space<vmem>>, vector<512x256xbf16>
    %6 = arith.truncf %4 : vector<8x512xf32> to vector<8x512xbf16>
    %cst = arith.constant dense<0.000000e+00> : vector<8x256xf32>
    %7 = tpu.matmul %6, %5, %cst {dimension_numbers = #tpu.dot_dimension_numbers<[1], [0], [0], [1], [0, 0, 1, 1], [], []>} : vector<8x512xbf16>, vector<512x256xbf16>, vector<8x256xf32> -> vector<8x256xf32>
    %8 = vector.broadcast %0 : vector<1x256xf32> to vector<8x256xf32>
    %9 = arith.mulf %7, %8 : vector<8x256xf32>
    %10 = vector.broadcast %1 : vector<1x256xf32> to vector<8x256xf32>
    %11 = arith.addf %9, %10 : vector<8x256xf32>
    %c0_10 = arith.constant 0 : index
    %c0_11 = arith.constant 0 : index
    %12 = memref.load %arg4[%c0_10, %c0_11] : memref<1x1xf32, #tpu.memory_space<smem>>
    %cst_12 = arith.constant 0.000000e+00 : f32
    %13 = vector.broadcast %cst_12 : f32 to vector<8x256xf32>
    %14 = arith.cmpf oge, %11, %13 : vector<8x256xf32>
    %15 = vector.broadcast %12 : f32 to vector<8x256xf32>
    %16 = arith.mulf %15, %11 : vector<8x256xf32>
    %17 = arith.select %14, %11, %16 : vector<8x256xi1>, vector<8x256xf32>
    %c0_13 = arith.constant 0 : index
    %c0_14 = arith.constant 0 : index
    %18 = vector.load %arg5[%c0_13, %c0_14] : memref<256x136xbf16, #tpu.memory_space<vmem>>, vector<256x136xbf16>
    %19 = arith.truncf %17 : vector<8x256xf32> to vector<8x256xbf16>
    %cst_15 = arith.constant dense<0.000000e+00> : vector<8x136xf32>
    %20 = tpu.matmul %19, %18, %cst_15 {dimension_numbers = #tpu.dot_dimension_numbers<[1], [0], [0], [1], [0, 0, 1, 1], [], []>} : vector<8x256xbf16>, vector<256x136xbf16>, vector<8x136xf32> -> vector<8x136xf32>
    %21 = vector.broadcast %2 : vector<1x136xf32> to vector<8x136xf32>
    %22 = arith.mulf %20, %21 : vector<8x136xf32>
    %23 = vector.broadcast %3 : vector<1x136xf32> to vector<8x136xf32>
    %24 = arith.addf %22, %23 : vector<8x136xf32>
    %c0_16 = arith.constant 0 : index
    %c0_17 = arith.constant 0 : index
    %25 = vector.load %arg7[%c0_16, %c0_17] : memref<8x136xf32, #tpu.memory_space<vmem>>, vector<8x136xf32>
    tpu.vector_store %arg7[%c0_16, %c0_17], %24 {strides = array<i32>} : memref<8x136xf32, #tpu.memory_space<vmem>>, vector<8x136xf32>,
    return
  }
  func.func @transform_0(%arg0: i32) -> (i32, i32) {
    %c0_i32 = arith.constant 0 : i32
    %c0_i32_0 = arith.constant 0 : i32
    %c0_i32_1 = arith.constant 0 : i32
    return %c0_i32, %c0_i32_0 : i32, i32
  }
  func.func @transform_1(%arg0: i32) -> (i32, i32) {
    %c0_i32 = arith.constant 0 : i32
    %c0_i32_0 = arith.constant 0 : i32
    %c0_i32_1 = arith.constant 0 : i32
    return %c0_i32, %c0_i32_0 : i32, i32
  }
  func.func @transform_2(%arg0: i32) -> (i32, i32) {
    %c0_i32 = arith.constant 0 : i32
    %c0_i32_0 = arith.constant 0 : i32
    %c0_i32_1 = arith.constant 0 : i32
    return %c0_i32, %c0_i32_0 : i32, i32
  }
  func.func @transform_3(%arg0: i32) -> (i32, i32) {
    %c0_i32 = arith.constant 0 : i32
    %c0_i32_0 = arith.constant 0 : i32
    %c0_i32_1 = arith.constant 0 : i32
    return %c0_i32, %c0_i32_0 : i32, i32
  }
  func.func @transform_4(%arg0: i32) -> (i32, i32) {
    %c0_i32 = arith.constant 0 : i32
    %c0_i32_0 = arith.constant 0 : i32
    %c0_i32_1 = arith.constant 0 : i32
    return %c0_i32, %c0_i32_0 : i32, i32
  }
  func.func @transform_5(%arg0: i32) -> (i32, i32) {
    %c0_i32 = arith.constant 0 : i32
    %c0_i32_0 = arith.constant 0 : i32
    %c0_i32_1 = arith.constant 0 : i32
    return %c0_i32, %c0_i32_0 : i32, i32
  }
  func.func @transform_6(%arg0: i32) -> (i32, i32) {
    %c0_i32 = arith.constant 0 : i32
    %c0_i32_0 = arith.constant 0 : i32
    %c0_i32_1 = arith.constant 0 : i32
    return %c0_i32, %c0_i32_0 : i32, i32
  }
}

</mosaic_0001>

<bundles_post_ra>
// kernel: tpu_custom_call.1
= control target key start
LH: loop header
LB: loop body
LE: loop exit
PB: predicated region body
PF: predicated region fallthrough
CT: control target
= control target key end

     0   :  { %12 = vsyncpa [#allocation4], 0  ;;  %s1290_s0 = inlined_call_operand.vmem [shape: f32[8,512], index: 0, kind: input, shape index: {}]   ;;  %s1291_s1 = inlined_call_operand.hbm [shape: bf16[512,256], index: 1, kind: input, shape index: {}]   ;;  %s1292_s2 = inlined_call_operand.vmem [shape: f32[2,256], index: 2, kind: input, shape index: {}]   ;;  %s1293_s3 = inlined_call_operand.<no memory space> [shape: f32[1,1], index: 3, kind: input, shape index: {}]   ;;  %s1294_s4 = inlined_call_operand.vmem [shape: bf16[256,136], index: 4, kind: input, shape index: {}]   ;;  %s1295_s5 = inlined_call_operand.vmem [shape: f32[2,136], index: 5, kind: input, shape index: {}]   ;;  %s1296_s6 = inlined_call_operand.hbm [shape: f32[8,136], index: 6, kind: output, shape index: {}]  }
   0x1   :  { %13 = vsyncpa [#allocation5], 0  ;;  %s1122_s21 = smov [#allocation3]  }
   0x2   :  { %s21_s22 = sshll.u32 %s1122_s21, 4  ;;  %s22_s22 = int_to_ptr.vmem [resolvable:$true] %s21_s22 }
   0x3   :  { %s1086_s23 = scalar_lea.vmem %s22_s22, 8192  ;;  %p1091_p1 = scmp.lt.s32.totalorder %s22_s22, %s22_s22 }
   0x4   :  { %p1087_p0 = scmp.ne.s32.totalorder %s22_s22, %s1086_s23  ;;  %p1092_p2 = scmp.lt.s32.totalorder %s1086_s23, %s1086_s23 }
   0x6   :  { %p1093_p3 = por %p1092_p2, %p1091_p1 }
   0x8   :  { %p1094_p4 = pnand %p1093_p3, %p1087_p0 }
   0xa   :  { %1097 = shalt.err (!%p1094_p4)
}
   0xb   :  { %s1123_s24 = smov 128   ;;  %s1124_s25 = smov 8  }
   0xc   :  { %27 = dma.hbm_to_vmem [thread:$0]  %s1291_s1, 8192, %s22_s22, [#allocation4], %s1123_s24, %s1123_s24, %s1124_s25  }
   0xd   :  { %1118 = dma.done.wait [#allocation4], 8192  }
   0xe   :  { %1119 = vsyncadd [#allocation4], 4294959104  ;;  %v934_v0 = vld [vmem:[#allocation3 + $0x74] ss:$8 sps:$4 sm:$0xff]   ;;  %v938_v2 = vld [vmem:[#allocation3 + $0x70] ss:$8 sps:$4 sm:$0xff]  }
   0xf   :  { %v936_v1 = vld [vmem:[#allocation3 + $0x174] ss:$8 sps:$4 sm:$0xff]   ;;  %437 = vmatprep.subr.bf16.mxu0 %v934_v0  ;;  %v939_v3 = vld [vmem:[#allocation3 + $0x170] ss:$8 sps:$4 sm:$0xff]   ;;  %v940_v4 = vld [vmem:[#allocation3 + $0x64] ss:$8 sps:$4 sm:$0xff]  }
  0x10   :  { %478 = vmatprep.subr.bf16.mxu1 %v936_v1  ;;  %438 = vmatpush1.bf16.msra.mxu0 %v938_v2  ;;  %v942_v5 = vld [vmem:[#allocation3 + $0x164] ss:$8 sps:$4 sm:$0xff]   ;;  %v944_v6 = vld [vmem:[#allocation3 + $0x60] ss:$8 sps:$4 sm:$0xff]   ;;  %v946_v8 = vld [vmem:[#allocation3 + $0x54] ss:$8 sps:$4 sm:$0xff]  }
  0x11   :  { %479 = vmatpush1.bf16.msra.mxu1 %v939_v3  ;;  %439 = vmatprep.subr.bf16.mxu0 %v940_v4  ;;  %v945_v7 = vld [vmem:[#allocation3 + $0x160] ss:$8 sps:$4 sm:$0xff]   ;;  %v948_v9 = vld [vmem:[#allocation3 + $0x154] ss:$8 sps:$4 sm:$0xff]   ;;  %v950_v10 = vld [vmem:[#allocation3 + $0x50] ss:$8 sps:$4 sm:$0xff]  }
  0x12   :  { %480 = vmatprep.subr.bf16.mxu1 %v942_v5  ;;  %v951_v11 = vld [vmem:[#allocation3 + $0x150] ss:$8 sps:$4 sm:$0xff]   ;;  %v952_v12 = vld [vmem:[#allocation3 + $0x44] ss:$8 sps:$4 sm:$0xff]   ;;  %v956_v14 = vld [vmem:[#allocation3 + $0x40] ss:$8 sps:$4 sm:$0xff]  }
  0x13   :  { %v954_v13 = vld [vmem:[#allocation3 + $0x144] ss:$8 sps:$4 sm:$0xff]   ;;  %v957_v15 = vld [vmem:[#allocation3 + $0x140] ss:$8 sps:$4 sm:$0xff]   ;;  %v958_v16 = vld [vmem:[#allocation3 + $0x34] ss:$8 sps:$4 sm:$0xff]  }
  0x14   :  { %440 = vmatpush1.bf16.msra.mxu0 %v944_v6  ;;  %v960_v17 = vld [vmem:[#allocation3 + $0x134] ss:$8 sps:$4 sm:$0xff]   ;;  %v962_v18 = vld [vmem:[#allocation3 + $0x30] ss:$8 sps:$4 sm:$0xff]   ;;  %v964_v20 = vld [vmem:[#allocation3 + $0x24] ss:$8 sps:$4 sm:$0xff]  }
  0x15   :  { %481 = vmatpush1.bf16.msra.mxu1 %v945_v7  ;;  %441 = vmatprep.subr.bf16.mxu0 %v946_v8  ;;  %v963_v19 = vld [vmem:[#allocation3 + $0x130] ss:$8 sps:$4 sm:$0xff]   ;;  %v966_v21 = vld [vmem:[#allocation3 + $0x124] ss:$8 sps:$4 sm:$0xff]   ;;  %v968_v22 = vld [vmem:[#allocation3 + $0x20] ss:$8 sps:$4 sm:$0xff]  }
  0x16   :  { %482 = vmatprep.subr.bf16.mxu1 %v948_v9  ;;  %v969_v23 = vld [vmem:[#allocation3 + $0x120] ss:$8 sps:$4 sm:$0xff]   ;;  %v970_v24 = vld [vmem:[#allocation3 + $0x14] ss:$8 sps:$4 sm:$0xff]   ;;  %v974_v26 = vld [vmem:[#allocation3 + $0x10] ss:$8 sps:$4 sm:$0xff]  }
  0x17   :  { %v972_v25 = vld [vmem:[#allocation3 + $0x114] ss:$8 sps:$4 sm:$0xff]   ;;  %v975_v27 = vld [vmem:[#allocation3 + $0x110] ss:$8 sps:$4 sm:$0xff]   ;;  %v976_v28 = vld [vmem:[#allocation3 + $0x4] ss:$8 sps:$4 sm:$0xff]  }
  0x18   :  { %442 = vmatpush1.bf16.msra.mxu0 %v950_v10  ;;  %v978_v29 = vld [vmem:[#allocation3 + $0x104] ss:$8 sps:$4 sm:$0xff]   ;;  %v980_v30 = vld [vmem:[#allocation3] ss:$8 sps:$4 sm:$0xff]   ;;  %v982_v32 = vld [vmem:[#allocation3 + $0xf4] ss:$8 sps:$4 sm:$0xff]  }
  0x19   :  { %483 = vmatpush1.bf16.msra.mxu1 %v951_v11  ;;  %443 = vmatprep.subr.bf16.mxu0 %v952_v12  ;;  %v981_v31 = vld [vmem:[#allocation3 + $0x100] ss:$8 sps:$4 sm:$0xff]   ;;  %v984_v33 = vld [vmem:[#allocation3 + $0x1f4] ss:$8 sps:$4 sm:$0xff]   ;;  %v986_v34 = vld [vmem:[#allocation3 + $0xf0] ss:$8 sps:$4 sm:$0xff]  }
  0x1a   :  { %484 = vmatprep.subr.bf16.mxu1 %v954_v13  ;;  %v987_v35 = vld [vmem:[#allocation3 + $0x1f0] ss:$8 sps:$4 sm:$0xff]   ;;  %v988_v36 = vld [vmem:[#allocation3 + $0xe4] ss:$8 sps:$4 sm:$0xff]   ;;  %v992_v38 = vld [vmem:[#allocation3 + $0xe0] ss:$8 sps:$4 sm:$0xff]  }
  0x1b   :  { %v990_v37 = vld [vmem:[#allocation3 + $0x1e4] ss:$8 sps:$4 sm:$0xff]   ;;  %v993_v39 = vld [vmem:[#allocation3 + $0x1e0] ss:$8 sps:$4 sm:$0xff]   ;;  %v994_v40 = vld [vmem:[#allocation3 + $0xd4] ss:$8 sps:$4 sm:$0xff]  }
  0x1c   :  { %444 = vmatpush1.bf16.msra.mxu0 %v956_v14  ;;  %v996_v41 = vld [vmem:[#allocation3 + $0x1d4] ss:$8 sps:$4 sm:$0xff]   ;;  %v998_v42 = vld [vmem:[#allocation3 + $0xd0] ss:$8 sps:$4 sm:$0xff]   ;;  %v1000_v44 = vld [vmem:[#allocation3 + $0xc4] ss:$8 sps:$4 sm:$0xff]  }
  0x1d   :  { %485 = vmatpush1.bf16.msra.mxu1 %v957_v15  ;;  %445 = vmatprep.subr.bf16.mxu0 %v958_v16  ;;  %v999_v43 = vld [vmem:[#allocation3 + $0x1d0] ss:$8 sps:$4 sm:$0xff]   ;;  %v1002_v45 = vld [vmem:[#allocation3 + $0x1c4] ss:$8 sps:$4 sm:$0xff]   ;;  %v1004_v47 = vld [vmem:[#allocation3 + $0xc0] ss:$8 sps:$4 sm:$0xff]  }
  0x1e   :  { %486 = vmatprep.subr.bf16.mxu1 %v960_v17  ;;  %v46_v46 = vld [vmem:[%s1290_s0 + $0x8] sm:$0xff]  ;;  %v48_v50 = vld [vmem:[%s1290_s0 + $0x18] sm:$0xff]  ;;  %v45_v4 = vld [vmem:[%s1290_s0] sm:$0xff]  ;;  %s1125_s28 = smov [#allocation6]   ;;  %vm815_vm2 = vcmask 64512  }
  0x1f   :  { %v1005_v48 = vld [vmem:[#allocation3 + $0x1c0] ss:$8 sps:$4 sm:$0xff]   ;;  %v114_v49 = vpack.c.bf16 %v46_v46, %v46_v46  ;;  %v1006_v51 = vld [vmem:[#allocation3 + $0xb4] ss:$8 sps:$4 sm:$0xff]   ;;  %v116_v52 = vpack.c.bf16 %v48_v50, %v48_v50  ;;  %v1010_v54 = vld [vmem:[#allocation3 + $0xb0] ss:$8 sps:$4 sm:$0xff]   ;;  %v113_v7 = vpack.c.bf16 %v45_v4, %v45_v4 }
  0x20   :  { %446 = vmatpush1.bf16.msra.mxu0 %v962_v18  ;;  %v1008_v53 = vld [vmem:[#allocation3 + $0x1b4] ss:$8 sps:$4 sm:$0xff]   ;;  %v1011_v55 = vld [vmem:[#allocation3 + $0x1b0] ss:$8 sps:$4 sm:$0xff]   ;;  %v1012_v56 = vld [vmem:[#allocation3 + $0xa4] ss:$8 sps:$4 sm:$0xff]  }
  0x21   :  { %487 = vmatpush1.bf16.msra.mxu1 %v963_v19  ;;  %447 = vmatprep.subr.bf16.mxu0 %v964_v20  ;;  %v1014_v57 = vld [vmem:[#allocation3 + $0x1a4] ss:$8 sps:$4 sm:$0xff]   ;;  %v1016_v58 = vld [vmem:[#allocation3 + $0xa0] ss:$8 sps:$4 sm:$0xff]   ;;  %v1018_v60 = vld [vmem:[#allocation3 + $0x94] ss:$8 sps:$4 sm:$0xff]  }
  0x22   :  { %488 = vmatprep.subr.bf16.mxu1 %v966_v21  ;;  %469 = vmatprep.mubr.bf16.mxu0 %v114_v49  ;;  %v1017_v59 = vld [vmem:[#allocation3 + $0x1a0] ss:$8 sps:$4 sm:$0xff]   ;;  %v1020_v61 = vld [vmem:[#allocation3 + $0x194] ss:$8 sps:$4 sm:$0xff]   ;;  %v1022_v62 = vld [vmem:[#allocation3 + $0x90] ss:$8 sps:$4 sm:$0xff]  }
  0x23   :  { %510 = vmatprep.mubr.bf16.mxu1 %v116_v52  ;;  %v1023_v63 = vld [vmem:[#allocation3 + $0x190] ss:$8 sps:$4 sm:$0xff]   ;;  %v1024_v0 = vld [vmem:[#allocation3 + $0x84] ss:$8 sps:$4 sm:$0xff]   ;;  %v1028_v2 = vld [vmem:[#allocation3 + $0x80] ss:$8 sps:$4 sm:$0xff]  }
  0x24   :  { %448 = vmatpush1.bf16.msra.mxu0 %v968_v22  ;;  %v1026_v1 = vld [vmem:[#allocation3 + $0x184] ss:$8 sps:$4 sm:$0xff]   ;;  %v1029_v3 = vld [vmem:[#allocation3 + $0x180] ss:$8 sps:$4 sm:$0xff]   ;;  %v47_v5 = vld [vmem:[%s1290_s0 + $0x10] sm:$0xff]  ;;  %s823_s29 = sshll.u32 %s1125_s28, 4  ;;  %s824_s29 = int_to_ptr.vmem [resolvable:$true] %s823_s29 }
  0x25   :  { %489 = vmatpush1.bf16.msra.mxu1 %v969_v23  ;;  %449 = vmatprep.subr.bf16.mxu0 %v970_v24  ;;  %v1032_v6 = vld [vmem:[%s1294_s4 + $0x74] ss:$8 sps:$4 sm:$0xff]   ;;  %v115_v8 = vpack.c.bf16 %v47_v5, %v47_v5  ;;  %v1030_v9 = vld [vmem:[%s1294_s4 + $0x70] ss:$8 sps:$4 sm:$0xff]   ;;  %v1035_v10 = vld [vmem:[%s1294_s4 + $0x64] ss:$8 sps:$4 sm:$0xff]   ;;  %p1103_p6 = scmp.lt.s32.totalorder %s824_s29, %s824_s29 }
  0x26   :  { %490 = vmatprep.subr.bf16.mxu1 %v972_v25  ;;  %v1033_v11 = vld [vmem:[%s1294_s4 + $0x60] ss:$8 sps:$4 sm:$0xff]   ;;  %v1038_v12 = vld [vmem:[%s1294_s4 + $0x54] ss:$8 sps:$4 sm:$0xff]   ;;  %v1036_v13 = vld [vmem:[%s1294_s4 + $0x50] ss:$8 sps:$4 sm:$0xff]  }
  0x27   :  { %v1041_v14 = vld [vmem:[%s1294_s4 + $0x44] ss:$8 sps:$4 sm:$0xff]   ;;  %v1039_v15 = vld [vmem:[%s1294_s4 + $0x40] ss:$8 sps:$4 sm:$0xff]   ;;  %v1044_v16 = vld [vmem:[%s1294_s4 + $0x34] ss:$8 sps:$4 sm:$0xff]  }
  0x28   :  { %450 = vmatpush1.bf16.msra.mxu0 %v974_v26  ;;  %v1042_v17 = vld [vmem:[%s1294_s4 + $0x30] ss:$8 sps:$4 sm:$0xff]   ;;  %v1047_v18 = vld [vmem:[%s1294_s4 + $0x24] ss:$8 sps:$4 sm:$0xff]   ;;  %v1045_v19 = vld [vmem:[%s1294_s4 + $0x20] ss:$8 sps:$4 sm:$0xff]  }
  0x29   :  { %491 = vmatpush1.bf16.msra.mxu1 %v975_v27  ;;  %451 = vmatprep.subr.bf16.mxu0 %v976_v28  ;;  %v1050_v20 = vld [vmem:[%s1294_s4 + $0x14] ss:$8 sps:$4 sm:$0xff]   ;;  %v1048_v21 = vld [vmem:[%s1294_s4 + $0x10] ss:$8 sps:$4 sm:$0xff]   ;;  %v1053_v22 = vld [vmem:[%s1294_s4 + $0x4] ss:$8 sps:$4 sm:$0xff]  }
  0x2a   :  { %492 = vmatprep.subr.bf16.mxu1 %v978_v29  ;;  %v1051_v23 = vld [vmem:[%s1294_s4] ss:$8 sps:$4 sm:$0xff]   ;;  %v1056_v24 = vld [vmem:[%s1294_s4 + $0xf4] ss:$8 sps:$4 sm:$0xff]   ;;  %v1054_v25 = vld [vmem:[%s1294_s4 + $0xf0] ss:$8 sps:$4 sm:$0xff]  }
  0x2b   :  { %v1059_v26 = vld [vmem:[%s1294_s4 + $0xe4] ss:$8 sps:$4 sm:$0xff]   ;;  %v1057_v27 = vld [vmem:[%s1294_s4 + $0xe0] ss:$8 sps:$4 sm:$0xff]   ;;  %v1062_v28 = vld [vmem:[%s1294_s4 + $0xd4] ss:$8 sps:$4 sm:$0xff]  }
  0x2c   :  { %452 = vmatpush1.bf16.msra.mxu0 %v980_v30  ;;  %v1060_v29 = vld [vmem:[%s1294_s4 + $0xd0] ss:$8 sps:$4 sm:$0xff]   ;;  %v1065_v30 = vld [vmem:[%s1294_s4 + $0xc4] ss:$8 sps:$4 sm:$0xff]   ;;  %s1098_s30 = scalar_lea.vmem %s824_s29, 256 }
  0x2d   :  { %493 = vmatpush1.bf16.msra.mxu1 %v981_v31  ;;  %453 = vmatprep.subr.bf16.mxu0 %v982_v32  ;;  %v1063_v31 = vld [vmem:[%s1294_s4 + $0xc0] ss:$8 sps:$4 sm:$0xff]   ;;  %v1068_v32 = vld [vmem:[%s1294_s4 + $0xb4] ss:$8 sps:$4 sm:$0xff]   ;;  %p1099_p5 = scmp.ne.s32.totalorder %s824_s29, %s1098_s30  ;;  %p1104_p7 = scmp.lt.s32.totalorder %s1098_s30, %s1098_s30 }
  0x2e   :  { %494 = vmatprep.subr.bf16.mxu1 %v984_v33  ;;  %v1066_v33 = vld [vmem:[%s1294_s4 + $0xb0] ss:$8 sps:$4 sm:$0xff]  }
  0x2f   :  { %p1105_p8 = por %p1104_p7, %p1103_p6 }
  0x30   :  { %454 = vmatpush2.bf16.msra.mxu0 %v986_v34  ;;  %v1071_v34 = vld [vmem:[%s1294_s4 + $0xa4] ss:$8 sps:$4 sm:$0xff]  }
  0x31   :  { %495 = vmatpush2.bf16.msra.mxu1 %v987_v35  ;;  %455 = vmatprep.subr.bf16.mxu0 %v988_v36  ;;  %v1069_v35 = vld [vmem:[%s1294_s4 + $0xa0] ss:$8 sps:$4 sm:$0xff]   ;;  %v1074_v36 = vld [vmem:[%s1294_s4 + $0x94] ss:$8 sps:$4 sm:$0xff]   ;;  %p1106_p9 = pnand %p1105_p8, %p1099_p5 }
  0x32   :  { %496 = vmatprep.subr.bf16.mxu1 %v990_v37  ;;  %v1072_v37 = vld [vmem:[%s1294_s4 + $0x90] ss:$8 sps:$4 sm:$0xff]  }
  0x34   :  { %456 = vmatpush2.bf16.msra.mxu0 %v992_v38  ;;  %v1077_v38 = vld [vmem:[%s1294_s4 + $0x84] ss:$8 sps:$4 sm:$0xff]  }
  0x35   :  { %497 = vmatpush2.bf16.msra.mxu1 %v993_v39  ;;  %457 = vmatprep.subr.bf16.mxu0 %v994_v40  ;;  %v1075_v39 = vld [vmem:[%s1294_s4 + $0x80] ss:$8 sps:$4 sm:$0xff]   ;;  %v520_v40 = vlaneseq }
  0x36   :  { %498 = vmatprep.subr.bf16.mxu1 %v996_v41 }
  0x37   :  { %v521_v41 = vshrl.u32 %v520_v40, 7 }
  0x38   :  { %458 = vmatpush2.bf16.msra.mxu0 %v998_v42 }
  0x39   :  { %499 = vmatpush2.bf16.msra.mxu1 %v999_v43  ;;  %459 = vmatprep.subr.bf16.mxu0 %v1000_v44  ;;  %v522_v42 = vsub.s32 0, %v521_v41  ;;  %v39_v43 = vld [vmem:[%s1292_s2] ss:$2 sm:$0x3]  ;;  %v526_v44 = vsub.s32 1, %v521_v41 }
  0x3a   :  { %500 = vmatprep.subr.bf16.mxu1 %v1002_v45  ;;  %v832_v45 = vld [vmem:[%s1292_s2 + $0x1] ss:$2 sm:$0x3] }
  0x3b   :  { %v523_v46 = vrot.slane %v39_v43, %v522_v42  ;;  %v536_v50 = vrot.slane %v832_v45, %v522_v42 }
  0x3c   :  { %460 = vmatpush2.bf16.msra.mxu0 %v1004_v47 }
  0x3d   :  { %501 = vmatpush2.bf16.msra.mxu1 %v1005_v48  ;;  %461 = vmatprep.subr.bf16.mxu0 %v1006_v51  ;;  %v527_v51 = vrot.slane %v39_v43, %v526_v44 }
  0x3e   :  { %502 = vmatprep.subr.bf16.mxu1 %v1008_v53 }
  0x40   :  { %462 = vmatpush2.bf16.msra.mxu0 %v1010_v54 }
  0x41   :  { %503 = vmatpush2.bf16.msra.mxu1 %v1011_v55  ;;  %463 = vmatprep.subr.bf16.mxu0 %v1012_v56  ;;  %v540_v56 = vrot.slane %v832_v45, %v526_v44 }
  0x42   :  { %504 = vmatprep.subr.bf16.mxu1 %v1014_v57  ;;  %v548_v57 = vstv %s1293_s3 }
  0x44   :  { %464 = vmatpush2.bf16.msra.mxu0 %v1016_v58 }
  0x45   :  { %505 = vmatpush2.bf16.msra.mxu1 %v1017_v59  ;;  %465 = vmatprep.subr.bf16.mxu0 %v1018_v60 }
  0x46   :  { %506 = vmatprep.subr.bf16.mxu1 %v1020_v61 }
  0x48   :  { %466 = vmatpush2.bf16.msra.mxu0 %v1022_v62 }
  0x49   :  { %507 = vmatpush2.bf16.msra.mxu1 %v1023_v63  ;;  %467 = vmatprep.subr.bf16.mxu0 %v1024_v0 }
  0x4a   :  { %508 = vmatprep.subr.bf16.mxu1 %v1026_v1 }
  0x4c   :  { %468 = vmatpush2.bf16.msra.mxu0 %v1028_v2 }
  0x4d   :  { %509 = vmatpush2.bf16.msra.mxu1 %v1029_v3  ;;  %747 = vmatprep.subr.bf16.mxu0 %v1032_v6 }
  0x4f   :  { %470 = vmatmul.mubr.bf16.vlgmr.msra.gmra.mxu0 %v113_v7  ;;  %v42_v7 = vld [vmem:[%s1295_s5] ss:$2 sm:$0x3] }
  0x50   :  { %511 = vmatmul.mubr.bf16.vlgmr.msra.gmra.mxu1 %v115_v8  ;;  %748 = vmatpush1.bf16.msra.mxu0 %v1030_v9  ;;  %v833_v8 = vld [vmem:[%s1295_s5 + $0x1] ss:$2 sm:$0x3]  ;;  %v792_v9 = vrot.slane %v42_v7, %v522_v42 }
  0x51   :  { %749 = vmatprep.subr.bf16.mxu0 %v1035_v10  ;;  %v805_v10 = vrot.slane %v833_v8, %v522_v42 }
  0x54   :  { %750 = vmatpush1.bf16.msra.mxu0 %v1033_v11  ;;  %v796_v11 = vrot.slane %v42_v7, %v526_v44 }
  0x55   :  { %751 = vmatprep.subr.bf16.mxu0 %v1038_v12 }
  0x58   :  { %752 = vmatpush1.bf16.msra.mxu0 %v1036_v13 }
  0x59   :  { %753 = vmatprep.subr.bf16.mxu0 %v1041_v14  ;;  %v809_v14 = vrot.slane %v833_v8, %v526_v44 }
  0x5c   :  { %754 = vmatpush1.bf16.msra.mxu0 %v1039_v15 }
  0x5d   :  { %755 = vmatprep.subr.bf16.mxu0 %v1044_v16 }
  0x60   :  { %756 = vmatpush1.bf16.msra.mxu0 %v1042_v17 }
  0x61   :  { %757 = vmatprep.subr.bf16.mxu0 %v1047_v18 }
  0x64   :  { %758 = vmatpush1.bf16.msra.mxu0 %v1045_v19 }
  0x65   :  { %759 = vmatprep.subr.bf16.mxu0 %v1050_v20 }
  0x68   :  { %760 = vmatpush1.bf16.msra.mxu0 %v1048_v21 }
  0x69   :  { %761 = vmatprep.subr.bf16.mxu0 %v1053_v22 }
  0x6c   :  { %762 = vmatpush1.bf16.msra.mxu0 %v1051_v23 }
  0x6d   :  { %763 = vmatprep.subr.bf16.mxu0 %v1056_v24 }
  0x70   :  { %764 = vmatpush2.bf16.msra.mxu0 %v1054_v25 }
  0x71   :  { %765 = vmatprep.subr.bf16.mxu0 %v1059_v26 }
  0x74   :  { %766 = vmatpush2.bf16.msra.mxu0 %v1057_v27 }
  0x75   :  { %767 = vmatprep.subr.bf16.mxu0 %v1062_v28 }
  0x78   :  { %768 = vmatpush2.bf16.msra.mxu0 %v1060_v29 }
  0x79   :  { %769 = vmatprep.subr.bf16.mxu0 %v1065_v30 }
  0x7c   :  { %770 = vmatpush2.bf16.msra.mxu0 %v1063_v31 }
  0x7d   :  { %771 = vmatprep.subr.bf16.mxu0 %v1068_v32 }
  0x80   :  { %772 = vmatpush2.bf16.msra.mxu0 %v1066_v33 }
  0x81   :  { %773 = vmatprep.subr.bf16.mxu0 %v1071_v34 }
  0x84   :  { %774 = vmatpush2.bf16.msra.mxu0 %v1069_v35 }
  0x85   :  { %775 = vmatprep.subr.bf16.mxu0 %v1074_v36 }
  0x88   :  { %776 = vmatpush2.bf16.msra.mxu0 %v1072_v37 }
  0x89   :  { %777 = vmatprep.subr.bf16.mxu0 %v1077_v38 }
  0x8c   :  { %778 = vmatpush2.bf16.msra.mxu0 %v1075_v39 }
 0x10f   :  { %v471_v47 = vpop.f32.mrf.mxu0 }
 0x110   :  { %v512_v48 = vpop.f32.mrf.mxu1 }
 0x111   :  { %v513_v49 = vadd.f32 %v512_v48, %v471_v47  ;;  %v473_v52 = vpop.f32.mrf.mxu0 }
 0x112   :  { %v514_v53 = vpop.f32.mrf.mxu1 }
 0x113   :  { %v530_v54 = vmul.f32 %v523_v46, %v513_v49  ;;  %v515_v55 = vadd.f32 %v514_v53, %v473_v52  ;;  %v475_v58 = vpop.f32.mrf.mxu0 }
 0x114   :  { %v516_v59 = vpop.f32.mrf.mxu1 }
 0x115   :  { %v543_v60 = vadd.f32 %v536_v50, %v530_v54  ;;  %v531_v61 = vmul.f32 %v527_v51, %v515_v55  ;;  %v476_v62 = vpop.f32.mrf.mxu0 }
 0x116   :  { %v517_v63 = vpop.f32.mrf.mxu1 }
 0x117   :  { %vm546_vm0 = vcmp.ge.f32.partialorder %v543_v60, 0.0  ;;  %v549_v0 = vmul.f32 %v548_v57, %v543_v60  ;;  %v544_v1 = vadd.f32 %v540_v56, %v531_v61 }
 0x119   :  { %vm547_vm1 = vcmp.ge.f32.partialorder %v544_v1, 0.0  ;;  %v550_v2 = vmul.f32 %v548_v57, %v544_v1  ;;  %v551_v3 = vsel %vm546_vm0, %v543_v60, %v549_v0 }
 0x11a   :  { %v585_v6 = vpack.c.bf16 %v551_v3, %v551_v3 }
 0x11b   :  { %v552_v4 = vsel %vm547_vm1, %v544_v1, %v550_v2 }
 0x11c   :  { %v586_v5 = vpack.c.bf16 %v552_v4, %v552_v4 }
 0x11e   :  { %779 = vmatprep.mubr.bf16.mxu0 %v586_v5 }
 0x11f   :  { %780 = vmatmul.mubr.bf16.vlgmr.msra.gmra.mxu0 %v585_v6 }
 0x1df   :  { %v781_v12 = vpop.f32.mrf.mxu0 }
 0x1e0   :  { %v799_v13 = vmul.f32 %v792_v9, %v781_v12 }
 0x1e1   :  { %v783_v15 = vpop.f32.mrf.mxu0 }
 0x1e2   :  { %v812_v16 = vadd.f32 %v805_v10, %v799_v13  ;;  %v800_v17 = vmul.f32 %v796_v11, %v783_v15 }
 0x1e3   :  { %v785_v18 = vpop.f32.mrf.mxu0 }
 0x1e4   :  { %814 = vst [vmem:[#allocation6] sm:$0xff] %v812_v16  ;;  %v813_v19 = vadd.f32 %v809_v14, %v800_v17 }
 0x1e5   :  { %v786_v20 = vpop.f32.mrf.mxu0 }
 0x1e6   :  { %816 = vst.msk [vmem:[#allocation6 + $0x8] sm:$0xff] %vm815_vm2, %v813_v19 }
 0x1e7   :  { %1109 = shalt.err (!%p1106_p9)
}
 0x1e8   :  { %826 = dma.vmem_to_hbm [thread:$0]  %s824_s29, 256, %s1296_s6, [#allocation5]  }
 0x1e9   :  { %1120 = dma.done.wait [#allocation5], 256  }
 0x1ea   :  { %1121 = vsyncadd [#allocation5], 4294967040 }
 0x1eb   :  { %830 = vsyncpa [#allocation4], 1 }
 0x1ec   :  { %831 = vsyncpa [#allocation5], 1 }

</bundles_post_ra>
